<compile_context>
chip_gen: v7x
topology: tpu7x:2x2x1
jax: 0.10.0
libtpu: 0.0.40
codegen_flags: <defaults>
</compile_context>

<pallas_src>
import numpy as np
import jax
import jax.numpy as jnp
from jax.experimental import pallas as pl
from jax.experimental.pallas import tpu as pltpu

# ----------------------------- irreps bookkeeping -----------------------------
SCALAR_MUL = 8                     # 8x0e
GATED_IRREPS = [(4, 1), (2, 2)]    # 4x1o + 2x2e

NS = SCALAR_MUL                                               # scalar dims = 8
NG = sum(mul for mul, _ in GATED_IRREPS)                      # gate dims   = 6
D_GATED = sum(mul * (2 * l + 1) for mul, l in GATED_IRREPS)   # gated dims  = 22
D_IN = NS + NG + D_GATED                                      # 36
D_OUT = NS + D_GATED                                          # 30

_LANE = 128  # TPU lane width


def _normalize2mom_const(act):
    """1/sqrt(E_{z~N(0,1)}[act(z)^2]) via deterministic quadrature (e3nn.math.normalize2mom)."""
    z = np.linspace(-10.0, 10.0, 400001)
    dz = z[1] - z[0]
    pdf = np.exp(-0.5 * z * z) / np.sqrt(2.0 * np.pi)
    m2 = float(np.sum(act(z) ** 2 * pdf) * dz)
    c = 1.0 / np.sqrt(m2)
    return 1.0 if abs(c - 1.0) < 1e-4 else float(c)


def _np_sigmoid(z):
    return 1.0 / (1.0 + np.exp(-z))


C_SILU = _normalize2mom_const(lambda z: z * _np_sigmoid(z))   # scalar act (0e -> silu)
C_SIGMOID = _normalize2mom_const(_np_sigmoid)                 # gate act   (0e -> sigmoid)


def _build_gate_expansion():
    """(NG, D_GATED) 0/1 matrix: row g is 1 on the (2l+1) components gated by gate g.
    Used only by the pure-JAX reference; the kernel does the broadcast on the VPU."""
    e = np.zeros((NG, D_GATED), dtype=np.float32)
    gate_idx, col = 0, 0
    for mul, l in GATED_IRREPS:
        dim = 2 * l + 1
        for _ in range(mul):
            e[gate_idx, col:col + dim] = 1.0
            gate_idx += 1
            col += dim
    return e


E_EXPAND_NP = _build_gate_expansion()


# --------------------------------- Pallas kernel ---------------------------------
def gate_kernel(x_ref, o_ref):
    # x_ref: (D_IN, TN)  -- irrep components on sublanes, nodes on lanes.
    # Compute in f32 even for bf16 I/O (v5e has no bf16 VPU/EUP datapath).
    x = x_ref[...].astype(jnp.float32)

    scalars = x[:NS, :]                 # (8,  TN)
    gates = x[NS:NS + NG, :]            # (6,  TN)
    gated = x[NS + NG:, :]              # (22, TN)

    # e3nn Activation with normalize2mom rescaling: silu on 0e scalars, sigmoid on 0e gates.
    act_s = C_SILU * scalars * jax.nn.sigmoid(scalars)
    act_g = C_SIGMOID * jax.nn.sigmoid(gates)

    # Scalars: rows [0, NS) of the output (full-lane-width store).
    o_ref[:NS, :] = act_s.astype(o_ref.dtype)

    # Gate broadcast on the VPU: each gate row scales the (2l+1) rows of its
    # gated irrep via a sublane broadcast — no MXU, no expansion-matrix input.
    g_idx, row = 0, 0
    for mul, l in GATED_IRREPS:
        dim = 2 * l + 1
        for _ in range(mul):
            prod = gated[row:row + dim, :] * act_g[g_idx:g_idx + 1, :]
            o_ref[NS + row:NS + row + dim, :] = prod.astype(o_ref.dtype)
            g_idx += 1
            row += dim


# --------------------------------- wrapper ---------------------------------
def _pick_tile(n):
    """Node tile on the lane axis: multiple of 128, as large as useful (<=2048),
    but keep >= 2 grid steps for big inputs so the 'parallel' axis can shard
    across v7x's 2 TensorCores. VMEM cost at 2048 is ~2 MB double-buffered."""
    n128 = _LANE * ((n + _LANE - 1) // _LANE)
    if n128 <= 4 * _LANE:
        return int(n128)                         # small problem: one tile
    half = (n128 // 2) // _LANE * _LANE
    return int(min(2048, max(_LANE, half)))


def ecomf_equivariant_gate(node_feature):
    """node_feature: (N, D_IN) float32/bf16 -> (N, D_OUT) same dtype."""
    n, d = node_feature.shape
    assert d == D_IN, (n, d)

    tn = _pick_tile(n)
    n_pad = tn * ((n + tn - 1) // tn)

    # Lane-dense layout: nodes on lanes, irrep components on sublanes.
    x_t = node_feature.T                                     # (D_IN, N)
    if n_pad != n:
        # Zero padding is benign: silu(0)=0 and sigmoid(0)*0=0; padded columns
        # are sliced off below anyway.
        x_t = jnp.pad(x_t, ((0, 0), (0, n_pad - n)))

    out_t = pl.pallas_call(
        gate_kernel,
        out_shape=jax.ShapeDtypeStruct((D_OUT, n_pad), node_feature.dtype),
        grid_spec=pltpu.PrefetchScalarGridSpec(
            num_scalar_prefetch=0,
            grid=(n_pad // tn,),
            in_specs=[pl.BlockSpec((D_IN, tn), lambda i: (0, i))],
            out_specs=pl.BlockSpec((D_OUT, tn), lambda i: (0, i)),
        ),
        compiler_params=pltpu.CompilerParams(
            dimension_semantics=("parallel",)),
    )(x_t)

    return out_t[:, :n].T                                    # (N, D_OUT)


# --------------------------------- reference ---------------------------------
def reference(node_feature):
    s = node_feature[:, :NS]
    g = node_feature[:, NS:NS + NG]
    gated = node_feature[:, NS + NG:]
    act_s = C_SILU * jax.nn.silu(s)
    act_g = C_SIGMOID * jax.nn.sigmoid(g)
    gate_exp = act_g @ jnp.asarray(E_EXPAND_NP)
    return jnp.concatenate([act_s, gated * gate_exp], axis=-1)


if __name__ == "__main__":
    key = jax.random.PRNGKey(0)
    N = 200   # not a multiple of 128 -> exercises the ragged-N padding path
    node_feature = jax.random.normal(key, (N, D_IN), dtype=jnp.float32)

    out = jax.block_until_ready(ecomf_equivariant_gate(node_feature))
    ref = jax.block_until_ready(reference(node_feature))

    assert out.shape == (N, D_OUT), out.shape
    assert np.allclose(np.asarray(out), np.asarray(ref), atol=1e-5, rtol=1e-5)
    print("KERNEL_OK")
</pallas_src>

<mosaic_0001>
module attributes {stable_mosaic.version = 11 : i64} {
  func.func @gate_kernel(%arg0: i32, %arg1: memref<36x256xf32, #tpu.memory_space<vmem>>, %arg2: memref<30x256xf32, #tpu.memory_space<vmem>>) attributes {dimension_semantics = [#tpu.dimension_semantics<parallel>], iteration_bounds = array<i64: 1>, scalar_prefetch = 0 : i64, scratch_operands = 0 : i64, tpu.core_type = #tpu.core_type<tc>, window_params = [{transform_indices = @transform_0, window_bounds = array<i64: 36, 256>}, {transform_indices = @transform_1, window_bounds = array<i64: 30, 256>}]} {
    %c0 = arith.constant 0 : index
    %c0_0 = arith.constant 0 : index
    %0 = vector.load %arg1[%c0, %c0_0] : memref<36x256xf32, #tpu.memory_space<vmem>>, vector<36x256xf32>
    %1 = vector.extract_strided_slice %0 {offsets = [0, 0], sizes = [8, 256], strides = [1, 1]} : vector<36x256xf32> to vector<8x256xf32>
    %2 = vector.extract_strided_slice %0 {offsets = [8, 0], sizes = [6, 256], strides = [1, 1]} : vector<36x256xf32> to vector<6x256xf32>
    %3 = vector.extract_strided_slice %0 {offsets = [14, 0], sizes = [22, 256], strides = [1, 1]} : vector<36x256xf32> to vector<22x256xf32>
    %cst = arith.constant 1.67653251 : f32
    %4 = vector.broadcast %cst : f32 to vector<8x256xf32>
    %5 = arith.mulf %4, %1 : vector<8x256xf32>
    %6 = arith.negf %1 : vector<8x256xf32>
    %7 = math.exp %6 : vector<8x256xf32>
    %cst_1 = arith.constant 1.000000e+00 : f32
    %8 = vector.broadcast %cst_1 : f32 to vector<8x256xf32>
    %9 = arith.addf %8, %7 : vector<8x256xf32>
    %10 = arith.divf %8, %9 : vector<8x256xf32>
    %11 = arith.mulf %5, %10 : vector<8x256xf32>
    %12 = arith.negf %2 : vector<6x256xf32>
    %13 = math.exp %12 : vector<6x256xf32>
    %cst_2 = arith.constant 1.000000e+00 : f32
    %14 = vector.broadcast %cst_2 : f32 to vector<6x256xf32>
    %15 = arith.addf %14, %13 : vector<6x256xf32>
    %16 = arith.divf %14, %15 : vector<6x256xf32>
    %cst_3 = arith.constant 1.8462286 : f32
    %17 = vector.broadcast %cst_3 : f32 to vector<6x256xf32>
    %18 = arith.mulf %17, %16 : vector<6x256xf32>
    %c0_4 = arith.constant 0 : index
    %c0_5 = arith.constant 0 : index
    %19 = vector.load %arg2[%c0_4, %c0_5] : memref<30x256xf32, #tpu.memory_space<vmem>>, vector<8x256xf32>
    tpu.vector_store %arg2[%c0_4, %c0_5], %11 {strides = array<i32>} : memref<30x256xf32, #tpu.memory_space<vmem>>, vector<8x256xf32>,
    %20 = vector.extract_strided_slice %3 {offsets = [0, 0], sizes = [3, 256], strides = [1, 1]} : vector<22x256xf32> to vector<3x256xf32>
    %21 = vector.extract_strided_slice %18 {offsets = [0, 0], sizes = [1, 256], strides = [1, 1]} : vector<6x256xf32> to vector<1x256xf32>
    %22 = vector.broadcast %21 : vector<1x256xf32> to vector<3x256xf32>
    %23 = arith.mulf %20, %22 : vector<3x256xf32>
    %c8 = arith.constant 8 : index
    %c0_6 = arith.constant 0 : index
    %24 = vector.load %arg2[%c8, %c0_6] : memref<30x256xf32, #tpu.memory_space<vmem>>, vector<3x256xf32>
    tpu.vector_store %arg2[%c8, %c0_6], %23 {strides = array<i32>} : memref<30x256xf32, #tpu.memory_space<vmem>>, vector<3x256xf32>,
    %25 = vector.extract_strided_slice %3 {offsets = [3, 0], sizes = [3, 256], strides = [1, 1]} : vector<22x256xf32> to vector<3x256xf32>
    %26 = vector.extract_strided_slice %18 {offsets = [1, 0], sizes = [1, 256], strides = [1, 1]} : vector<6x256xf32> to vector<1x256xf32>
    %27 = vector.broadcast %26 : vector<1x256xf32> to vector<3x256xf32>
    %28 = arith.mulf %25, %27 : vector<3x256xf32>
    %c11 = arith.constant 11 : index
    %c0_7 = arith.constant 0 : index
    %29 = vector.load %arg2[%c11, %c0_7] : memref<30x256xf32, #tpu.memory_space<vmem>>, vector<3x256xf32>
    tpu.vector_store %arg2[%c11, %c0_7], %28 {strides = array<i32>} : memref<30x256xf32, #tpu.memory_space<vmem>>, vector<3x256xf32>,
    %30 = vector.extract_strided_slice %3 {offsets = [6, 0], sizes = [3, 256], strides = [1, 1]} : vector<22x256xf32> to vector<3x256xf32>
    %31 = vector.extract_strided_slice %18 {offsets = [2, 0], sizes = [1, 256], strides = [1, 1]} : vector<6x256xf32> to vector<1x256xf32>
    %32 = vector.broadcast %31 : vector<1x256xf32> to vector<3x256xf32>
    %33 = arith.mulf %30, %32 : vector<3x256xf32>
    %c14 = arith.constant 14 : index
    %c0_8 = arith.constant 0 : index
    %34 = vector.load %arg2[%c14, %c0_8] : memref<30x256xf32, #tpu.memory_space<vmem>>, vector<3x256xf32>
    tpu.vector_store %arg2[%c14, %c0_8], %33 {strides = array<i32>} : memref<30x256xf32, #tpu.memory_space<vmem>>, vector<3x256xf32>,
    %35 = vector.extract_strided_slice %3 {offsets = [9, 0], sizes = [3, 256], strides = [1, 1]} : vector<22x256xf32> to vector<3x256xf32>
    %36 = vector.extract_strided_slice %18 {offsets = [3, 0], sizes = [1, 256], strides = [1, 1]} : vector<6x256xf32> to vector<1x256xf32>
    %37 = vector.broadcast %36 : vector<1x256xf32> to vector<3x256xf32>
    %38 = arith.mulf %35, %37 : vector<3x256xf32>
    %c17 = arith.constant 17 : index
    %c0_9 = arith.constant 0 : index
    %39 = vector.load %arg2[%c17, %c0_9] : memref<30x256xf32, #tpu.memory_space<vmem>>, vector<3x256xf32>
    tpu.vector_store %arg2[%c17, %c0_9], %38 {strides = array<i32>} : memref<30x256xf32, #tpu.memory_space<vmem>>, vector<3x256xf32>,
    %40 = vector.extract_strided_slice %3 {offsets = [12, 0], sizes = [5, 256], strides = [1, 1]} : vector<22x256xf32> to vector<5x256xf32>
    %41 = vector.extract_strided_slice %18 {offsets = [4, 0], sizes = [1, 256], strides = [1, 1]} : vector<6x256xf32> to vector<1x256xf32>
    %42 = vector.broadcast %41 : vector<1x256xf32> to vector<5x256xf32>
    %43 = arith.mulf %40, %42 : vector<5x256xf32>
    %c20 = arith.constant 20 : index
    %c0_10 = arith.constant 0 : index
    %44 = vector.load %arg2[%c20, %c0_10] : memref<30x256xf32, #tpu.memory_space<vmem>>, vector<5x256xf32>
    tpu.vector_store %arg2[%c20, %c0_10], %43 {strides = array<i32>} : memref<30x256xf32, #tpu.memory_space<vmem>>, vector<5x256xf32>,
    %45 = vector.extract_strided_slice %3 {offsets = [17, 0], sizes = [5, 256], strides = [1, 1]} : vector<22x256xf32> to vector<5x256xf32>
    %46 = vector.extract_strided_slice %18 {offsets = [5, 0], sizes = [1, 256], strides = [1, 1]} : vector<6x256xf32> to vector<1x256xf32>
    %47 = vector.broadcast %46 : vector<1x256xf32> to vector<5x256xf32>
    %48 = arith.mulf %45, %47 : vector<5x256xf32>
    %c25 = arith.constant 25 : index
    %c0_11 = arith.constant 0 : index
    %49 = vector.load %arg2[%c25, %c0_11] : memref<30x256xf32, #tpu.memory_space<vmem>>, vector<5x256xf32>
    tpu.vector_store %arg2[%c25, %c0_11], %48 {strides = array<i32>} : memref<30x256xf32, #tpu.memory_space<vmem>>, vector<5x256xf32>,
    return
  }
  func.func @transform_0(%arg0: i32) -> (i32, i32) {
    %c0_i32 = arith.constant 0 : i32
    %c0_i32_0 = arith.constant 0 : i32
    return %c0_i32, %arg0 : i32, i32
  }
  func.func @transform_1(%arg0: i32) -> (i32, i32) {
    %c0_i32 = arith.constant 0 : i32
    %c0_i32_0 = arith.constant 0 : i32
    return %c0_i32, %arg0 : i32, i32
  }
}

</mosaic_0001>

<bundles_post_ra>
// kernel: tpu_custom_call.1
= control target key start
LH: loop header
LB: loop body
LE: loop exit
PB: predicated region body
PF: predicated region fallthrough
CT: control target
= control target key end

     0   :  { %6 = vsyncpa [#allocation3], 0  ;;  %s349_s0 = inlined_call_operand.hbm [shape: f32[36,256], index: 0, kind: input, shape index: {}]   ;;  %s350_s1 = inlined_call_operand.hbm [shape: f32[30,256], index: 1, kind: output, shape index: {}]  }
   0x1   :  { %7 = vsyncpa [#allocation4], 0  ;;  %s291_s6 = smov [#allocation2]   ;;  %s243_s10 = scalar_lea.hbm %s349_s0, 1280 }
   0x2   :  { %s13_s7 = sshll.u32 %s291_s6, 4  ;;  %p244_p0 = scmp.ne.s32.totalorder %s349_s0, %s243_s10  ;;  %s14_s7 = int_to_ptr.vmem [resolvable:$true] %s13_s7 }
   0x3   :  { %p247_p1 = scmp.lt.u32.totalorder %s243_s10, %s349_s0 }
   0x5   :  { %p249_p2 = pnand %p247_p1, %p244_p0 }
   0x7   :  { %252 = shalt.err (!%p249_p2)
}
   0x8   :  { %s253_s15 = scalar_lea.vmem %s14_s7, 1280  ;;  %p258_p4 = scmp.lt.s32.totalorder %s14_s7, %s14_s7 }
   0x9   :  { %p254_p3 = scmp.ne.s32.totalorder %s14_s7, %s253_s15  ;;  %p259_p5 = scmp.lt.s32.totalorder %s253_s15, %s253_s15 }
   0xb   :  { %p260_p6 = por %p259_p5, %p258_p4 }
   0xd   :  { %p261_p7 = pnand %p260_p6, %p254_p3 }
   0xf   :  { %264 = shalt.err (!%p261_p7)
}
  0x10   :  { %s292_s16 = smov 256   ;;  %s293_s17 = smov 16  }
  0x11   :  { %19 = dma.hbm_to_vmem [thread:$0]  %s349_s0, 1280, %s14_s7, [#allocation3], %s292_s16, %s292_s16, %s293_s17  }
  0x12   :  { %287 = dma.done.wait [#allocation3], 1280  }
  0x13   :  { %288 = vsyncadd [#allocation3], 4294966016  ;;  %v23_v0 = vld [vmem:[#allocation2] sm:$0xff]  ;;  %v24_v1 = vld [vmem:[#allocation2 + $0x8] sm:$0xff]  ;;  %v65_v16 = vlaneseq  ;;  %vm81_vm0 = vcmask 1041408   ;;  %s294_s0 = smov [#allocation5]  }
  0x14   :  { %v25_v2 = vld [vmem:[#allocation2 + $0x10] sm:$0xff]  ;;  %v219_v3 = vmul.f32 -1.442695, %v23_v0  ;;  %v220_v4 = vmul.f32 -1.442695, %v24_v1  ;;  %v26_v6 = vld [vmem:[#allocation2 + $0x18] sm:$0xff] }
  0x15   :  { %v221_v5 = vmul.f32 -1.442695, %v25_v2  ;;  %v222_v7 = vmul.f32 -1.442695, %v26_v6  ;;  %v320_v17 = vshrl.u32 %v65_v16, 7  ;;  %v27_v31 = vld [vmem:[#allocation2 + $0x20] sm:$0xff] }
  0x16   :  { %227 = vpow2.f32 %v219_v3  ;;  %v33_v18 = vmul.f32 1.6765325, %v23_v0  ;;  %v34_v19 = vmul.f32 1.6765325, %v24_v1  ;;  %v28_v36 = vld [vmem:[#allocation2 + $0x28] sm:$0xff]  ;;  %v29_v52 = vld [vmem:[#allocation2 + $0x30] sm:$0xff] }
  0x17   :  { %229 = vpow2.f32 %v220_v4  ;;  %v67_v21 = vsub.s32 0, %v320_v17  ;;  %v94_v24 = vsub.s32 1, %v320_v17  ;;  %v112_v25 = vsub.s32 2, %v320_v17  ;;  %v30_v57 = vld [vmem:[#allocation2 + $0x38] sm:$0xff]  ;;  %s207_s20 = sshll.u32 %s294_s0, 4  ;;  %s208_s20 = int_to_ptr.vmem [resolvable:$true] %s207_s20 }
  0x18   :  { %231 = vpow2.f32 %v221_v5  ;;  %v132_v26 = vsub.s32 3, %v320_v17  ;;  %v158_v33 = vsub.s32 4, %v320_v17  ;;  %v178_v34 = vsub.s32 5, %v320_v17  ;;  %s265_s21 = scalar_lea.vmem %s208_s20, 1024  ;;  %p270_p9 = scmp.lt.s32.totalorder %s208_s20, %s208_s20 }
  0x19   :  { %233 = vpow2.f32 %v222_v7  ;;  %p266_p8 = scmp.ne.s32.totalorder %s208_s20, %s265_s21  ;;  %p271_p10 = scmp.lt.s32.totalorder %s265_s21, %s265_s21 }
  0x1b   :  { %p272_p11 = por %p271_p10, %p270_p9 }
  0x1d   :  { %p273_p12 = pnand %p272_p11, %p266_p8 }
  0x20   :  { %v228_v8 = vpop.eup %227 }
  0x21   :  { %v230_v9 = vpop.eup %229  ;;  %v41_v10 = vadd.f32 1.0, %v228_v8 }
  0x22   :  { %v232_v11 = vpop.eup %231  ;;  %v42_v12 = vadd.f32 1.0, %v230_v9 }
  0x23   :  { %v234_v13 = vpop.eup %233  ;;  %235 = vrcp.f32 %v41_v10  ;;  %v55_v14 = vadd.f32 1.0, %v232_v11 }
  0x24   :  { %237 = vrcp.f32 %v42_v12  ;;  %v56_v15 = vadd.f32 1.0, %v234_v13 }
  0x25   :  { %239 = vrcp.f32 %v55_v14  ;;  %v32_v14 = vld [vmem:[#allocation2 + $0x48] sm:$0xf] }
  0x26   :  { %241 = vrcp.f32 %v56_v15 }
  0x2d   :  { %v236_v20 = vpop.eup %235 }
  0x2e   :  { %v238_v22 = vpop.eup %237  ;;  %v47_v23 = vmul.f32 %v236_v20, %v33_v18 }
  0x2f   :  { %v240_v27 = vpop.eup %239  ;;  %v48_v28 = vmul.f32 %v238_v22, %v34_v19 }
  0x30   :  { %v242_v29 = vpop.eup %241  ;;  %63 = vst [vmem:[#allocation5] sm:$0xff] %v47_v23  ;;  %v61_v30 = vmul.f32 1.8462286, %v240_v27 }
  0x31   :  { %64 = vst [vmem:[#allocation5 + $0x8] sm:$0xff] %v48_v28  ;;  %v62_v32 = vmul.f32 1.8462286, %v242_v29 }
  0x32   :  { %v68_v35 = vrot.slane %v61_v30, %v67_v21  ;;  %v95_v37 = vrot.slane %v61_v30, %v94_v24  ;;  %v113_v38 = vrot.slane %v61_v30, %v112_v25  ;;  %v133_v39 = vrot.slane %v61_v30, %v132_v26 }
  0x33   :  { %v72_v40 = vrot.slane %v62_v32, %v67_v21  ;;  %v99_v41 = vrot.slane %v62_v32, %v94_v24  ;;  %v117_v42 = vrot.slane %v62_v32, %v112_v25  ;;  %v137_v43 = vrot.slane %v62_v32, %v132_v26 }
  0x34   :  { %v73_v44 = vmul.f32 %v68_v35, %v25_v2  ;;  %v75_v45 = vmul.f32 %v68_v35, %v27_v31  ;;  %v100_v46 = vmul.f32 %v95_v37, %v27_v31  ;;  %v118_v47 = vmul.f32 %v113_v38, %v27_v31 }
  0x35   :  { %v74_v48 = vmul.f32 %v72_v40, %v26_v6  ;;  %v76_v49 = vmul.f32 %v72_v40, %v28_v36  ;;  %v101_v50 = vmul.f32 %v99_v41, %v28_v36  ;;  %v119_v51 = vmul.f32 %v117_v42, %v28_v36  ;;  %v31_v6 = vld [vmem:[#allocation2 + $0x40] sm:$0xf] }
  0x36   :  { %v82_v53 = vrot.slane %v73_v44, 6  ;;  %v83_v54 = vrot.slane %v75_v45, 6  ;;  %v104_v55 = vrot.slane %v100_v46, 6  ;;  %v122_v56 = vrot.slane %v118_v47, 6 }
  0x37   :  { %v85_v58 = vrot.slane %v74_v48, 6  ;;  %v86_v59 = vrot.slane %v76_v49, 6  ;;  %v105_v60 = vrot.slane %v101_v50, 6  ;;  %v123_v61 = vrot.slane %v119_v51, 6 }
  0x38   :  { %v84_v62 = vsel %vm81_vm0, %v82_v53, %v83_v54  ;;  %108 = vst [vmem:[#allocation5 + $0x10] sm:$0x38] %v104_v55  ;;  %126 = vst [vmem:[#allocation5 + $0x20] ss:$-12 sps:$4 sm:$0xc1] %v122_v56   ;;  %v138_v63 = vmul.f32 %v133_v39, %v27_v31  ;;  %v140_v0 = vmul.f32 %v133_v39, %v29_v52 }
  0x39   :  { %v139_v1 = vmul.f32 %v137_v43, %v28_v36  ;;  %90 = vst [vmem:[#allocation5 + $0x10] sm:$0x7] %v84_v62  ;;  %v87_v2 = vsel %vm81_vm0, %v85_v58, %v86_v59  ;;  %109 = vst [vmem:[#allocation5 + $0x18] sm:$0x38] %v105_v60  ;;  %v141_v3 = vmul.f32 %v137_v43, %v30_v57 }
  0x3a   :  { %127 = vst [vmem:[#allocation5 + $0x28] ss:$-12 sps:$4 sm:$0xc1] %v123_v61   ;;  %v159_v4 = vrot.slane %v61_v30, %v158_v33  ;;  %v163_v5 = vrot.slane %v62_v32, %v158_v33  ;;  %91 = vst [vmem:[#allocation5 + $0x18] sm:$0x7] %v87_v2  ;;  %v146_v7 = vrot.slane %v138_v63, 6  ;;  %v179_v10 = vrot.slane %v61_v30, %v178_v34 }
  0x3b   :  { %v147_v8 = vrot.slane %v140_v0, 6  ;;  %v149_v9 = vrot.slane %v139_v1, 6  ;;  %v150_v11 = vrot.slane %v141_v3, 6  ;;  %v183_v15 = vrot.slane %v62_v32, %v178_v34 }
  0x3c   :  { %v164_v12 = vmul.f32 %v159_v4, %v29_v52  ;;  %v165_v13 = vmul.f32 %v163_v5, %v30_v57  ;;  %v184_v17 = vmul.f32 %v179_v10, %v29_v52  ;;  %v186_v18 = vmul.f32 %v179_v10, %v31_v6 }
  0x3d   :  { %v148_v16 = vsel %vm81_vm0, %v146_v7, %v147_v8  ;;  %v151_v19 = vsel %vm81_vm0, %v149_v9, %v150_v11  ;;  %v185_v22 = vmul.f32 %v183_v15, %v30_v57  ;;  %v187_v25 = vmul.f32 %v183_v15, %v32_v14 }
  0x3e   :  { %154 = vst [vmem:[#allocation5 + $0x20] sm:$0xe] %v148_v16  ;;  %v168_v20 = vrot.slane %v164_v12, 6  ;;  %v169_v21 = vrot.slane %v165_v13, 6  ;;  %155 = vst [vmem:[#allocation5 + $0x28] sm:$0xe] %v151_v19 }
  0x3f   :  { %v192_v23 = vrot.slane %v184_v17, 6  ;;  %v193_v24 = vrot.slane %v186_v18, 6  ;;  %v195_v26 = vrot.slane %v185_v22, 6  ;;  %v196_v28 = vrot.slane %v187_v25, 6 }
  0x40   :  { %172 = vst [vmem:[#allocation5 + $0x30] ss:$-12 sps:$4 sm:$0xf1] %v168_v20   ;;  %173 = vst [vmem:[#allocation5 + $0x38] ss:$-12 sps:$4 sm:$0xf1] %v169_v21  }
  0x41   :  { %v194_v27 = vsel %vm81_vm0, %v192_v23, %v193_v24  ;;  %v197_v29 = vsel %vm81_vm0, %v195_v26, %v196_v28 }
  0x42   :  { %200 = vst [vmem:[#allocation5 + $0x30] sm:$0x3e] %v194_v27  ;;  %201 = vst [vmem:[#allocation5 + $0x38] sm:$0x3e] %v197_v29 }
  0x43   :  { %276 = shalt.err (!%p273_p12)
}
  0x44   :  { %s277_s24 = scalar_lea.hbm %s350_s1, 1024 }
  0x45   :  { %p278_p13 = scmp.ne.s32.totalorder %s350_s1, %s277_s24  ;;  %p281_p0 = scmp.lt.u32.totalorder %s277_s24, %s350_s1 }
  0x47   :  { %p283_p1 = pnand %p281_p0, %p278_p13 }
  0x49   :  { %286 = shalt.err (!%p283_p1)
}
  0x4a   :  { %213 = dma.vmem_to_hbm [thread:$0]  %s208_s20, 1024, %s350_s1, [#allocation4], %s292_s16, %s292_s16, %s293_s17  }
  0x4b   :  { %289 = dma.done.wait [#allocation4], 1024  }
  0x4c   :  { %290 = vsyncadd [#allocation4], 4294966272 }
  0x4d   :  { %217 = vsyncpa [#allocation3], 1 }
  0x4e   :  { %218 = vsyncpa [#allocation4], 1 }

</bundles_post_ra>
